<compile_context>
chip_gen: v7x
topology: tpu7x:2x2x1
jax: 0.10.0
libtpu: 0.0.40
codegen_flags: <defaults>
</compile_context>

<pallas_src>
import functools
import math

import jax
import jax.numpy as jnp
from jax.experimental import pallas as pl
from jax.experimental.pallas import tpu as pltpu


def _round_up(x: int, m: int) -> int:
    return ((x + m - 1) // m) * m


def _build_pos_table(d_hid: int, n_positions: int) -> jnp.ndarray:
    """Exactly the PositionalEncoding buffer from the reference ([n_positions, d_hid])."""
    position = jnp.arange(n_positions, dtype=jnp.float32)[:, None]
    div_term = jnp.exp(
        jnp.arange(0, d_hid, 2, dtype=jnp.float32) * -(math.log(10000.0) / d_hid)
    )
    pe = jnp.zeros((n_positions, d_hid), jnp.float32)
    pe = pe.at[:, 0::2].set(jnp.sin(position * div_term))
    pe = pe.at[:, 1::2].set(jnp.cos(position * div_term))
    return pe


def _saits_embed_kernel(*refs, with_pos: bool):
    # refs (no pos):  date, deltas, x, mask, w_date, w_delta, w_x, w_mask, bias, out, acc
    # refs (pos):     ... , bias, pos, out, acc
    if with_pos:
        (date_ref, delta_ref, x_ref, mask_ref,
         wd_ref, wl_ref, wx_ref, wm_ref, b_ref, pos_ref, out_ref, acc_ref) = refs
    else:
        (date_ref, delta_ref, x_ref, mask_ref,
         wd_ref, wl_ref, wx_ref, wm_ref, b_ref, out_ref, acc_ref) = refs
        pos_ref = None

    # Four K-split dots accumulated into one f32 VMEM scratch (each weight block
    # is already padded to the full d_total lane width, so the result lands
    # directly in its lane range with no in-kernel concatenation).
    acc_ref[...] = jnp.dot(date_ref[...], wd_ref[...], preferred_element_type=jnp.float32)
    acc_ref[...] += jnp.dot(delta_ref[...], wl_ref[...], preferred_element_type=jnp.float32)
    acc_ref[...] += jnp.dot(x_ref[...], wx_ref[...], preferred_element_type=jnp.float32)
    acc_ref[...] += jnp.dot(mask_ref[...], wm_ref[...], preferred_element_type=jnp.float32)

    res = acc_ref[...] + b_ref[...]              # single fused [1, d_total] bias
    if pos_ref is not None:
        res = res + pos_ref[...]                 # PE tile, blocked along time
    out_ref[...] = res.astype(out_ref.dtype)


def saits_embedding_forward(X, observed_mask, date, deltas, params, *,
                            with_pos: bool, n_max_steps: int = 1000,
                            dropout: float = 0.0,
                            compute_dtype=jnp.float32,
                            out_dtype=None,
                            max_tile_rows: int = 2048):
    """Pallas forward of SaitsEmbedding. All data inputs are [B, T, *].

    compute_dtype: dtype fed to the MXU (f32 default for exact parity; bf16 only
        pays off if the inputs already arrive in bf16 or the cast fuses upstream).
    out_dtype: dtype of the result (default = X.dtype); bf16 here halves the
        dominant output write stream.
    """
    B, T, nf = X.shape
    date_dim = date.shape[-1]
    wt, bt = params["W_temporal"], params["b_temporal"]   # [date_dim+nf, temporal_dim], [temporal_dim]
    we, be = params["W_embed"], params["b_embed"]         # [2*nf, d_out], [d_out]
    d_t_in, temporal_dim = wt.shape
    d_in, d_out = we.shape
    assert d_t_in == date_dim + nf, (d_t_in, date_dim, nf)
    assert d_in == 2 * nf, (d_in, nf)
    d_total = temporal_dim + d_out
    f32 = jnp.float32
    cd = jnp.dtype(compute_dtype)
    od = jnp.dtype(out_dtype) if out_dtype is not None else jnp.dtype(X.dtype)

    # --- fused, K-split, lane-padded weights (block-diagonal layout) ---------
    wt_full = jnp.concatenate(
        [wt.astype(f32), jnp.zeros((d_t_in, d_out), f32)], axis=1)       # [d_t_in, d_total]
    we_full = jnp.concatenate(
        [jnp.zeros((d_in, temporal_dim), f32), we.astype(f32)], axis=1)  # [d_in, d_total]
    w_date  = wt_full[:date_dim].astype(cd)     # [date_dim, d_total]
    w_delta = wt_full[date_dim:].astype(cd)     # [nf,       d_total]
    w_x     = we_full[:nf].astype(cd)           # [nf,       d_total]
    w_mask  = we_full[nf:].astype(cd)           # [nf,       d_total]
    bias = jnp.concatenate([bt.astype(f32), be.astype(f32)]).reshape(1, d_total)

    # sub-32-bit dtypes pack 16 rows per sublane tile -> force a 16-row alignment
    row_align = max(8 * (4 // cd.itemsize), 8 * (4 // od.itemsize), 8)

    weight_specs = [
        pl.BlockSpec((date_dim, d_total), lambda *a: (0, 0)),
        pl.BlockSpec((nf, d_total),       lambda *a: (0, 0)),
        pl.BlockSpec((nf, d_total),       lambda *a: (0, 0)),
        pl.BlockSpec((nf, d_total),       lambda *a: (0, 0)),
        pl.BlockSpec((1, d_total),        lambda *a: (0, 0)),
    ]
    compiler_params = pltpu.CompilerParams(
        dimension_semantics=("parallel", "parallel") if with_pos else ("parallel",),
        vmem_limit_bytes=32 * 1024 * 1024)

    # TODO(synk): nn.Dropout (training-mode random mask) not implemented; dropout=0 path only.

    if not with_pos:
        # ---- main path: collapse (B, T) into rows, large fixed row tile -----
        N = B * T
        date2  = date.reshape(N, date_dim).astype(cd)
        delta2 = deltas.reshape(N, nf).astype(cd)
        x2     = X.reshape(N, nf).astype(cd)
        mask2  = observed_mask.reshape(N, nf).astype(cd)

        tile = min(max_tile_rows, _round_up(N, row_align))
        # VMEM budget per grid step (everything lane-padded to 128 lanes):
        #   4 inputs x 2 buffers + output x 2 buffers + f32 accumulator.
        per_row = 4 * 2 * 128 * cd.itemsize + 2 * 128 * od.itemsize + 128 * 4
        vmem_cap_rows = max(row_align, ((24 << 20) // per_row) // row_align * row_align)
        tile = min(tile, vmem_cap_rows)
        # Keep >= 2 grid steps when possible so both v7x TensorCores get work.
        if tile >= N and N > row_align:
            tile = _round_up((N + 1) // 2, row_align)
        grid = (pl.cdiv(N, tile),)   # ragged last tile handled by boundary masking

        in_specs = [
            pl.BlockSpec((tile, date_dim), lambda r: (r, 0)),
            pl.BlockSpec((tile, nf),       lambda r: (r, 0)),
            pl.BlockSpec((tile, nf),       lambda r: (r, 0)),
            pl.BlockSpec((tile, nf),       lambda r: (r, 0)),
        ] + weight_specs

        out = pl.pallas_call(
            functools.partial(_saits_embed_kernel, with_pos=False),
            out_shape=jax.ShapeDtypeStruct((N, d_total), od),
            grid_spec=pltpu.PrefetchScalarGridSpec(
                num_scalar_prefetch=0,
                grid=grid,
                in_specs=in_specs,
                out_specs=pl.BlockSpec((tile, d_total), lambda r: (r, 0)),
                scratch_shapes=[pltpu.VMEM((tile, d_total), f32)]),
            compiler_params=compiler_params,
        )(date2, delta2, x2, mask2, w_date, w_delta, w_x, w_mask, bias)
        return out.reshape(B, T, d_total)

    # ---- with_pos=True path --------------------------------------------------
    # The reference builds a PE of width d_out and broadcast-adds it to an
    # embedding of width temporal_dim + d_out; that is only valid when
    # d_out == d_total and d_out is even (other configs fail in PyTorch too).
    if d_out % 2 != 0 or d_out != d_total:
        raise ValueError(
            f"with_pos=True adds a PE of width {d_out} to an embedding of width "
            f"{d_total}; this broadcast is invalid (the PyTorch reference fails too).")

    pe = _build_pos_table(d_out, n_max_steps)[:T]          # [T, d_total] f32, tiny
    t_tile = min(max_tile_rows, _round_up(T, row_align))
    grid = (B, pl.cdiv(T, t_tile))                         # (batch, time-tiles)

    datec  = date.astype(cd)
    deltac = deltas.astype(cd)
    xc     = X.astype(cd)
    maskc  = observed_mask.astype(cd)

    in_specs = [
        pl.BlockSpec((None, t_tile, date_dim), lambda b, ti: (b, ti, 0)),
        pl.BlockSpec((None, t_tile, nf),       lambda b, ti: (b, ti, 0)),
        pl.BlockSpec((None, t_tile, nf),       lambda b, ti: (b, ti, 0)),
        pl.BlockSpec((None, t_tile, nf),       lambda b, ti: (b, ti, 0)),
    ] + weight_specs + [
        pl.BlockSpec((t_tile, d_total),        lambda b, ti: (ti, 0)),   # PE table
    ]

    out = pl.pallas_call(
        functools.partial(_saits_embed_kernel, with_pos=True),
        out_shape=jax.ShapeDtypeStruct((B, T, d_total), od),
        grid_spec=pltpu.PrefetchScalarGridSpec(
            num_scalar_prefetch=0,
            grid=grid,
            in_specs=in_specs,
            out_specs=pl.BlockSpec((None, t_tile, d_total), lambda b, ti: (b, ti, 0)),
            scratch_shapes=[pltpu.VMEM((t_tile, d_total), f32)]),
        compiler_params=compiler_params,
    )(datec, deltac, xc, maskc, w_date, w_delta, w_x, w_mask, bias, pe)
    return out


def _reference_forward(X, observed_mask, date, deltas, params, *, with_pos,
                       n_max_steps=1000):
    """Pure-JAX reference mirroring the PyTorch forward (for verification)."""
    ti = jnp.concatenate([date, deltas], axis=2)
    t_emb = ti @ params["W_temporal"] + params["b_temporal"]
    xm = jnp.concatenate([X, observed_mask], axis=2)
    x_emb = xm @ params["W_embed"] + params["b_embed"]
    out = jnp.concatenate([t_emb, x_emb], axis=2)
    if with_pos:
        pe = _build_pos_table(params["W_embed"].shape[1], n_max_steps)[: X.shape[1]]
        out = out + pe[None]
    return out


if __name__ == "__main__":
    def make_inputs(key, B, T, n_features, date_dim, temporal_dim, d_out):
        k = jax.random.split(key, 8)
        X = jax.random.normal(k[0], (B, T, n_features), jnp.float32)
        observed_mask = (jax.random.uniform(k[1], (B, T, n_features)) > 0.3).astype(jnp.float32)
        date = jax.random.normal(k[2], (B, T, date_dim), jnp.float32)
        deltas = jax.random.uniform(k[3], (B, T, n_features), jnp.float32)
        params = {
            "W_temporal": 0.1 * jax.random.normal(
                k[4], (date_dim + n_features, temporal_dim), jnp.float32),
            "b_temporal": 0.1 * jax.random.normal(k[5], (temporal_dim,), jnp.float32),
            "W_embed": 0.1 * jax.random.normal(
                k[6], (2 * n_features, d_out), jnp.float32),
            "b_embed": 0.1 * jax.random.normal(k[7], (d_out,), jnp.float32),
        }
        return X, observed_mask, date, deltas, params

    # Module-consistent config: date_frequence='s' -> 6 date features.
    n_features, date_dim, temporal_dim, d_out = 5, 6, 16, 32
    d_total = temporal_dim + d_out

    # Test 1: small shapes (B=2, T=8 -> 16 rows, 2 grid steps), f32.
    B, T = 2, 8
    X, M, D, Dl, P = make_inputs(jax.random.PRNGKey(0), B, T, n_features,
                                 date_dim, temporal_dim, d_out)
    out = jax.block_until_ready(
        saits_embedding_forward(X, M, D, Dl, P, with_pos=False))
    ref = _reference_forward(X, M, D, Dl, P, with_pos=False)
    assert out.shape == (B, T, d_total), out.shape
    assert jnp.allclose(out, ref, atol=1e-5, rtol=1e-5), "mismatch vs reference (small, f32)"

    # Test 2: larger shapes (B=8, T=100 -> 800 rows, 2x400-row tiles), f32.
    B2, T2 = 8, 100
    X2, M2, D2, Dl2, P2 = make_inputs(jax.random.PRNGKey(1), B2, T2, n_features,
                                      date_dim, temporal_dim, d_out)
    out2 = jax.block_until_ready(
        saits_embedding_forward(X2, M2, D2, Dl2, P2, with_pos=False))
    ref2 = _reference_forward(X2, M2, D2, Dl2, P2, with_pos=False)
    assert out2.shape == (B2, T2, d_total), out2.shape
    assert jnp.allclose(out2, ref2, atol=1e-5, rtol=1e-5), "mismatch vs reference (large, f32)"

    # Test 3: bf16 matmul inputs + bf16 output (halved output write stream).
    out3 = jax.block_until_ready(
        saits_embedding_forward(X2, M2, D2, Dl2, P2, with_pos=False,
                                compute_dtype=jnp.bfloat16, out_dtype=jnp.bfloat16))
    assert out3.dtype == jnp.bfloat16
    assert jnp.allclose(out3.astype(jnp.float32), ref2, atol=3e-2, rtol=3e-2), \
        "mismatch vs reference (bf16)"

    # Test 4: with_pos=True (only broadcast-valid when temporal_dim == 0):
    # PE table fed blocked along time, never materialized at [N, d_total].
    X4, M4, D4, Dl4, P4 = make_inputs(jax.random.PRNGKey(2), B, T, n_features,
                                      date_dim, 0, d_out)
    out4 = jax.block_until_ready(
        saits_embedding_forward(X4, M4, D4, Dl4, P4, with_pos=True))
    ref4 = _reference_forward(X4, M4, D4, Dl4, P4, with_pos=True)
    assert out4.shape == (B, T, d_out), out4.shape
    assert jnp.allclose(out4, ref4, atol=1e-5, rtol=1e-5), "mismatch vs reference (with_pos)"

    print("KERNEL_OK")
</pallas_src>

<mosaic_0001>
module attributes {stable_mosaic.version = 11 : i64} {
  func.func @_saits_embed_kernel(%arg0: i32, %arg1: memref<8x6xf32, #tpu.memory_space<vmem>>, %arg2: memref<8x5xf32, #tpu.memory_space<vmem>>, %arg3: memref<8x5xf32, #tpu.memory_space<vmem>>, %arg4: memref<8x5xf32, #tpu.memory_space<vmem>>, %arg5: memref<6x48xf32, #tpu.memory_space<vmem>>, %arg6: memref<5x48xf32, #tpu.memory_space<vmem>>, %arg7: memref<5x48xf32, #tpu.memory_space<vmem>>, %arg8: memref<5x48xf32, #tpu.memory_space<vmem>>, %arg9: memref<1x48xf32, #tpu.memory_space<vmem>>, %arg10: memref<8x48xf32, #tpu.memory_space<vmem>>, %arg11: memref<8x48xf32, #tpu.memory_space<vmem>>) attributes {dimension_semantics = [#tpu.dimension_semantics<parallel>], iteration_bounds = array<i64: 2>, scalar_prefetch = 0 : i64, scratch_operands = 1 : i64, tpu.core_type = #tpu.core_type<tc>, window_params = [{transform_indices = @transform_0, window_bounds = array<i64: 8, 6>}, {transform_indices = @transform_1, window_bounds = array<i64: 8, 5>}, {transform_indices = @transform_2, window_bounds = array<i64: 8, 5>}, {transform_indices = @transform_3, window_bounds = array<i64: 8, 5>}, {pipeline_mode = #tpu.pipeline_mode<synchronous>, transform_indices = @transform_4, window_bounds = array<i64: 6, 48>}, {pipeline_mode = #tpu.pipeline_mode<synchronous>, transform_indices = @transform_5, window_bounds = array<i64: 5, 48>}, {pipeline_mode = #tpu.pipeline_mode<synchronous>, transform_indices = @transform_6, window_bounds = array<i64: 5, 48>}, {pipeline_mode = #tpu.pipeline_mode<synchronous>, transform_indices = @transform_7, window_bounds = array<i64: 5, 48>}, {pipeline_mode = #tpu.pipeline_mode<synchronous>, transform_indices = @transform_8, window_bounds = array<i64: 1, 48>}, {transform_indices = @transform_9, window_bounds = array<i64: 8, 48>}]} {
    %c0 = arith.constant 0 : index
    %c0_0 = arith.constant 0 : index
    %0 = vector.load %arg1[%c0, %c0_0] : memref<8x6xf32, #tpu.memory_space<vmem>>, vector<8x6xf32>
    %c0_1 = arith.constant 0 : index
    %c0_2 = arith.constant 0 : index
    %1 = vector.load %arg5[%c0_1, %c0_2] : memref<6x48xf32, #tpu.memory_space<vmem>>, vector<6x48xf32>
    %cst = arith.constant dense<0.000000e+00> : vector<8x48xf32>
    %2 = tpu.matmul %0, %1, %cst {dimension_numbers = #tpu.dot_dimension_numbers<[1], [0], [0], [1], [0, 0, 1, 1], [], []>} : vector<8x6xf32>, vector<6x48xf32>, vector<8x48xf32> -> vector<8x48xf32>
    %c0_3 = arith.constant 0 : index
    %c0_4 = arith.constant 0 : index
    %3 = vector.load %arg11[%c0_3, %c0_4] : memref<8x48xf32, #tpu.memory_space<vmem>>, vector<8x48xf32>
    tpu.vector_store %arg11[%c0_3, %c0_4], %2 {strides = array<i32>} : memref<8x48xf32, #tpu.memory_space<vmem>>, vector<8x48xf32>,
    %c0_5 = arith.constant 0 : index
    %c0_6 = arith.constant 0 : index
    %4 = vector.load %arg11[%c0_5, %c0_6] : memref<8x48xf32, #tpu.memory_space<vmem>>, vector<8x48xf32>
    %c0_7 = arith.constant 0 : index
    %c0_8 = arith.constant 0 : index
    %5 = vector.load %arg2[%c0_7, %c0_8] : memref<8x5xf32, #tpu.memory_space<vmem>>, vector<8x5xf32>
    %c0_9 = arith.constant 0 : index
    %c0_10 = arith.constant 0 : index
    %6 = vector.load %arg6[%c0_9, %c0_10] : memref<5x48xf32, #tpu.memory_space<vmem>>, vector<5x48xf32>
    %cst_11 = arith.constant dense<0.000000e+00> : vector<8x48xf32>
    %7 = tpu.matmul %5, %6, %cst_11 {dimension_numbers = #tpu.dot_dimension_numbers<[1], [0], [0], [1], [0, 0, 1, 1], [], []>} : vector<8x5xf32>, vector<5x48xf32>, vector<8x48xf32> -> vector<8x48xf32>
    %8 = arith.addf %4, %7 : vector<8x48xf32>
    %c0_12 = arith.constant 0 : index
    %c0_13 = arith.constant 0 : index
    %9 = vector.load %arg11[%c0_12, %c0_13] : memref<8x48xf32, #tpu.memory_space<vmem>>, vector<8x48xf32>
    tpu.vector_store %arg11[%c0_12, %c0_13], %8 {strides = array<i32>} : memref<8x48xf32, #tpu.memory_space<vmem>>, vector<8x48xf32>,
    %c0_14 = arith.constant 0 : index
    %c0_15 = arith.constant 0 : index
    %10 = vector.load %arg11[%c0_14, %c0_15] : memref<8x48xf32, #tpu.memory_space<vmem>>, vector<8x48xf32>
    %c0_16 = arith.constant 0 : index
    %c0_17 = arith.constant 0 : index
    %11 = vector.load %arg3[%c0_16, %c0_17] : memref<8x5xf32, #tpu.memory_space<vmem>>, vector<8x5xf32>
    %c0_18 = arith.constant 0 : index
    %c0_19 = arith.constant 0 : index
    %12 = vector.load %arg7[%c0_18, %c0_19] : memref<5x48xf32, #tpu.memory_space<vmem>>, vector<5x48xf32>
    %cst_20 = arith.constant dense<0.000000e+00> : vector<8x48xf32>
    %13 = tpu.matmul %11, %12, %cst_20 {dimension_numbers = #tpu.dot_dimension_numbers<[1], [0], [0], [1], [0, 0, 1, 1], [], []>} : vector<8x5xf32>, vector<5x48xf32>, vector<8x48xf32> -> vector<8x48xf32>
    %14 = arith.addf %10, %13 : vector<8x48xf32>
    %c0_21 = arith.constant 0 : index
    %c0_22 = arith.constant 0 : index
    %15 = vector.load %arg11[%c0_21, %c0_22] : memref<8x48xf32, #tpu.memory_space<vmem>>, vector<8x48xf32>
    tpu.vector_store %arg11[%c0_21, %c0_22], %14 {strides = array<i32>} : memref<8x48xf32, #tpu.memory_space<vmem>>, vector<8x48xf32>,
    %c0_23 = arith.constant 0 : index
    %c0_24 = arith.constant 0 : index
    %16 = vector.load %arg11[%c0_23, %c0_24] : memref<8x48xf32, #tpu.memory_space<vmem>>, vector<8x48xf32>
    %c0_25 = arith.constant 0 : index
    %c0_26 = arith.constant 0 : index
    %17 = vector.load %arg4[%c0_25, %c0_26] : memref<8x5xf32, #tpu.memory_space<vmem>>, vector<8x5xf32>
    %c0_27 = arith.constant 0 : index
    %c0_28 = arith.constant 0 : index
    %18 = vector.load %arg8[%c0_27, %c0_28] : memref<5x48xf32, #tpu.memory_space<vmem>>, vector<5x48xf32>
    %cst_29 = arith.constant dense<0.000000e+00> : vector<8x48xf32>
    %19 = tpu.matmul %17, %18, %cst_29 {dimension_numbers = #tpu.dot_dimension_numbers<[1], [0], [0], [1], [0, 0, 1, 1], [], []>} : vector<8x5xf32>, vector<5x48xf32>, vector<8x48xf32> -> vector<8x48xf32>
    %20 = arith.addf %16, %19 : vector<8x48xf32>
    %c0_30 = arith.constant 0 : index
    %c0_31 = arith.constant 0 : index
    %21 = vector.load %arg11[%c0_30, %c0_31] : memref<8x48xf32, #tpu.memory_space<vmem>>, vector<8x48xf32>
    tpu.vector_store %arg11[%c0_30, %c0_31], %20 {strides = array<i32>} : memref<8x48xf32, #tpu.memory_space<vmem>>, vector<8x48xf32>,
    %c0_32 = arith.constant 0 : index
    %c0_33 = arith.constant 0 : index
    %22 = vector.load %arg11[%c0_32, %c0_33] : memref<8x48xf32, #tpu.memory_space<vmem>>, vector<8x48xf32>
    %c0_34 = arith.constant 0 : index
    %c0_35 = arith.constant 0 : index
    %23 = vector.load %arg9[%c0_34, %c0_35] : memref<1x48xf32, #tpu.memory_space<vmem>>, vector<1x48xf32>
    %24 = vector.broadcast %23 : vector<1x48xf32> to vector<8x48xf32>
    %25 = arith.addf %22, %24 : vector<8x48xf32>
    %c0_36 = arith.constant 0 : index
    %c0_37 = arith.constant 0 : index
    %26 = vector.load %arg10[%c0_36, %c0_37] : memref<8x48xf32, #tpu.memory_space<vmem>>, vector<8x48xf32>
    tpu.vector_store %arg10[%c0_36, %c0_37], %25 {strides = array<i32>} : memref<8x48xf32, #tpu.memory_space<vmem>>, vector<8x48xf32>,
    return
  }
  func.func @transform_0(%arg0: i32) -> (i32, i32) {
    %c0_i32 = arith.constant 0 : i32
    %c0_i32_0 = arith.constant 0 : i32
    return %arg0, %c0_i32 : i32, i32
  }
  func.func @transform_1(%arg0: i32) -> (i32, i32) {
    %c0_i32 = arith.constant 0 : i32
    %c0_i32_0 = arith.constant 0 : i32
    return %arg0, %c0_i32 : i32, i32
  }
  func.func @transform_2(%arg0: i32) -> (i32, i32) {
    %c0_i32 = arith.constant 0 : i32
    %c0_i32_0 = arith.constant 0 : i32
    return %arg0, %c0_i32 : i32, i32
  }
  func.func @transform_3(%arg0: i32) -> (i32, i32) {
    %c0_i32 = arith.constant 0 : i32
    %c0_i32_0 = arith.constant 0 : i32
    return %arg0, %c0_i32 : i32, i32
  }
  func.func @transform_4(%arg0: i32) -> (i32, i32) {
    %c0_i32 = arith.constant 0 : i32
    %c0_i32_0 = arith.constant 0 : i32
    %c0_i32_1 = arith.constant 0 : i32
    return %c0_i32, %c0_i32_0 : i32, i32
  }
  func.func @transform_5(%arg0: i32) -> (i32, i32) {
    %c0_i32 = arith.constant 0 : i32
    %c0_i32_0 = arith.constant 0 : i32
    %c0_i32_1 = arith.constant 0 : i32
    return %c0_i32, %c0_i32_0 : i32, i32
  }
  func.func @transform_6(%arg0: i32) -> (i32, i32) {
    %c0_i32 = arith.constant 0 : i32
    %c0_i32_0 = arith.constant 0 : i32
    %c0_i32_1 = arith.constant 0 : i32
    return %c0_i32, %c0_i32_0 : i32, i32
  }
  func.func @transform_7(%arg0: i32) -> (i32, i32) {
    %c0_i32 = arith.constant 0 : i32
    %c0_i32_0 = arith.constant 0 : i32
    %c0_i32_1 = arith.constant 0 : i32
    return %c0_i32, %c0_i32_0 : i32, i32
  }
  func.func @transform_8(%arg0: i32) -> (i32, i32) {
    %c0_i32 = arith.constant 0 : i32
    %c0_i32_0 = arith.constant 0 : i32
    %c0_i32_1 = arith.constant 0 : i32
    return %c0_i32, %c0_i32_0 : i32, i32
  }
  func.func @transform_9(%arg0: i32) -> (i32, i32) {
    %c0_i32 = arith.constant 0 : i32
    %c0_i32_0 = arith.constant 0 : i32
    return %arg0, %c0_i32 : i32, i32
  }
}

</mosaic_0001>

<bundles_post_ra>
// kernel: tpu_custom_call.1
= control target key start
LH: loop header
LB: loop body
LE: loop exit
PB: predicated region body
PF: predicated region fallthrough
CT: control target
= control target key end

     0   :  { %s1172_s0 = inlined_call_operand.vmem [shape: f32[16,6], index: 0, kind: input, shape index: {}]   ;;  %s1173_s1 = inlined_call_operand.vmem [shape: f32[16,5], index: 1, kind: input, shape index: {}]   ;;  %s1174_s2 = inlined_call_operand.vmem [shape: f32[16,5], index: 2, kind: input, shape index: {}]   ;;  %s1175_s3 = inlined_call_operand.vmem [shape: f32[16,5], index: 3, kind: input, shape index: {}]   ;;  %s1176_s4 = inlined_call_operand.vmem [shape: f32[6,48], index: 4, kind: input, shape index: {}]   ;;  %s1177_s5 = inlined_call_operand.vmem [shape: f32[5,48], index: 5, kind: input, shape index: {}]   ;;  %s1178_s6 = inlined_call_operand.vmem [shape: f32[5,48], index: 6, kind: input, shape index: {}]   ;;  %s1179_s7 = inlined_call_operand.vmem [shape: f32[5,48], index: 7, kind: input, shape index: {}]   ;;  %s1180_s8 = inlined_call_operand.vmem [shape: f32[1,48], index: 8, kind: input, shape index: {}]   ;;  %s1181_s9 = inlined_call_operand.hbm [shape: f32[16,48], index: 9, kind: output, shape index: {}]  }
   0x1   :  { %1182 = sst [smem:[#allocation6_spill]] %s1172_s0 }
   0x2   :  { %1183 = sst [smem:[#allocation7_spill]] %s1176_s4 }
   0x3   :  { %1184 = sst [smem:[#allocation8_spill]] %s1177_s5 }
   0x4   :  { %14 = vsyncpa [#allocation4], 0 }
   0x5   :  { %16 = vsyncpa [#allocation4 + $0x1], 0  ;;  %s1033_s30 = smov 0   ;;  %s1035_s10 = smov 0  }
   0x6   :  { %s1037_s11 = smov 0   ;;  %s1039_s12 = smov 0  }
   0x7 LB: > { %s1054_s13 = sadd.s32 4294967295, %s978_s12   ;;  %s825_s14 = sadd.s32 4294967294, %s978_s12   ;;  %s978_s12 = sphi %s1039_s12, %s1193_s12   ;;  %s974_s11 = sphi %s1037_s11, %s1192_s11   ;;  %s970_s10 = sphi %s1035_s10, %s1191_s10   ;;  %s966_s30 = sphi %s1033_s30, %s1190_s30  }
   0x8   : > { %s1058_s15 = sadd.s32 1, %s978_s12   ;;  %s238_s16 = sadd.s32 1, %s974_s11 }
   0x9   : > { %s235_s17 = ssub.s32 %s978_s12, %s1058_s15  ;;  %p248_p0 = scmp.ne.s32.totalorder %s974_s11, %s970_s10 }
   0xa   : > { %p236_p1 = scmp.eq.s32.totalorder %s235_s17, 0  ;;  %p249_p2 = scmp.eq.s32.totalorder %s1054_s13, 1 }
   0xb   : > { %p254_p3 = scmp.ne.s32.totalorder %s970_s10, %s966_s30  ;;  %p255_p4 = scmp.eq.s32.totalorder %s825_s14, 1 }
   0xc   : > { %s1069_s18 = scalar_select %p236_p1, %s974_s11, %s238_s16  }
   0xd   : > { %p1071_p5 = por %p249_p2, %p248_p0  ;;  %p1075_p6 = por %p255_p4, %p254_p3 }
   0xe   : > { %p828_p7 = scmp.ge.s32.totalorder %s978_s12, 1  ;;  %p316_p8 = scmp.lt.s32.totalorder %s978_s12, 3 }
  0x10   : > { %p317_p9 = pnand %p828_p7, %p316_p8 }
  0x11   : > { %s1187_s4 = sld [smem:[#allocation7_spill]] (!%p317_p9)  ;;  %vm385_vm0 = vcmask (!%p317_p9), 1045504   ;;  %p363_p10 = scmp.lt.s32.totalorder (!%p317_p9), %s1054_s13, 1  ;;  %v980_v1 = vmov (!%p317_p9), 0.0   ;;  %vm981_vm1 = vmmov (!%p317_p9), 0   ;;  %vm468_vm2 = vcmask (!%p317_p9), 1044480  }
  0x12   : > { %320 = sbr.rel (%p317_p9) target bundleno = 296 (0x128), region = 56  ;;  %855 = vmatprep.subr.mxu0 (!%p317_p9), %v980_v1  ;;  %857 = vmatprep.mubr.msk.f32.mxu0 (!%p317_p9), %vm981_vm1, %v980_v1  ;;  %s1188_s5 = sld [smem:[#allocation8_spill]] (!%p317_p9)  ;;  %vm381_vm3 = vcmask (!%p317_p9), 48128   ;;  %vm464_vm4 = vcmask (!%p317_p9), 39936   ;;  %v546_v3 = vld [vmem:[%s1178_s6] sm:$0x1f] (!%p317_p9) }
  0x13   : > { %860 = vmatprep.subr.mxu1 (!%p317_p9), %v980_v1  ;;  %862 = vmatprep.mubr.msk.f32.mxu1 (!%p317_p9), %vm981_vm1, %v980_v1  ;;  %s1189_s0 = sld [smem:[#allocation6_spill]] (!%p317_p9)  ;;  %v627_v6 = vld [vmem:[%s1179_s7] sm:$0x1f] (!%p317_p9)  ;;  %vm459_vm5 = vcmask (!%p317_p9), 392192  }
  0x14   : > { %v842_v23 = vld [vmem:[%s1180_s8] ss:$0 sm:$0xff] (!%p317_p9) }
  0x17   : > { %v380_v0 = vld [vmem:[%s1187_s4] sm:$0x3f] (!%p317_p9) }
  0x18   : > { %v463_v2 = vld [vmem:[%s1188_s5] sm:$0x1f] (!%p317_p9)  ;;  %856 = vmatpush3.msk.msra.mxu0 (!%p317_p9), %vm385_vm0, %v380_v0 }
  0x19   : > { %s364_s25 = scalar_select %p363_p10, %s1054_s13, 1  ;;  %861 = vmatpush3.msk.msra.mxu1 %vm468_vm2, %v463_v2  ;;  %865 = vmatprep.subr.mxu0 %v980_v1 }
  0x1a   : > { %870 = vmatprep.subr.mxu1 %v980_v1 }
  0x1b   : > { %s830_s26 = sshll.u32 %s364_s25, 3 }
  0x1c   : > { %s366_s29 = scalar_lea.vmem %s1189_s0, %s830_s26  ;;  %s370_s17 = scalar_lea.vmem %s1173_s1, %s830_s26 }
  0x1d   : > { %v379_v4 = vld [vmem:[%s366_s29] sm:$0xff]  ;;  %s374_s25 = scalar_lea.vmem %s1174_s2, %s830_s26  ;;  %s378_s0 = scalar_lea.vmem %s1175_s3, %s830_s26 }
  0x1e   : > { %v462_v5 = vld [vmem:[%s370_s17] sm:$0xff]  ;;  %858 = vmatmul.mubr.msk.f32.vlgmr.msra.gmra.mrb[0].mxu0 %vm381_vm3, %v379_v4  ;;  %s844_s29 = sshll.u32 %s1054_s13, 7  ;;  %s982_s13 = smov [#allocation3]  }
  0x1f   : > { %863 = vmatmul.mubr.msk.f32.vlgmr.msra.gmra.mrb[0].mxu1 %vm464_vm4, %v462_v5  ;;  %866 = vmatpush3.msk.msra.mxu0 %vm468_vm2, %v546_v3  ;;  %v545_v7 = vld [vmem:[%s374_s25] sm:$0xff]  ;;  %s1129_s22 = scalar_lea.hbm %s1181_s9, %s844_s29  ;;  %s920_s25 = sshll.u32 %s982_s13, 4  ;;  %s921_s25 = int_to_ptr.vmem [resolvable:$false] %s920_s25 }
  0x20   : > { %867 = vmatprep.mubr.msk.f32.mxu0 %vm981_vm1, %v980_v1  ;;  %v626_v8 = vld [vmem:[%s378_s0] sm:$0xff]  ;;  %871 = vmatpush3.msk.msra.mxu1 %vm468_vm2, %v627_v6  ;;  %s360_s0 = sand.u32 1, %s970_s10   ;;  %s922_s27 = scalar_lea.vmem %s921_s25, 256 }
  0x21   : > { %872 = vmatprep.mubr.msk.f32.mxu1 %vm981_vm1, %v980_v1  ;;  %s829_s4 = sshll.u32 %s360_s0, 3  ;;  %s717_s23 = scalar_lea.sflag [#allocation4], %s360_s0 }
  0x22   : > { %868 = vmatmul.mubr.msk.f32.vlgmr.msra.gmra.mrb[2].mxu0 %vm464_vm4, %v545_v7  ;;  %s362_s14 = scalar_lea.vmem [#allocation3], %s829_s4 }
  0x23   : > { %873 = vmatmul.mubr.msk.f32.vlgmr.msra.gmra.mrb[2].mxu1 %vm464_vm4, %v626_v8  ;;  %s730_s16 = sshll.u32 %s362_s14, 4  ;;  %s1131_s16 = int_to_ptr.vmem [resolvable:$true] %s730_s16 }
  0x24   : > { %s916_s24 = scalar_lea.vmem %s1131_s16, 128  ;;  %p923_p0 = scmp.lt.s32.totalorder %s1131_s16, %s921_s25 }
  0x25   : > { %p917_p11 = scmp.ne.s32.totalorder %s1131_s16, %s916_s24  ;;  %p924_p1 = scmp.lt.s32.totalorder %s922_s27, %s916_s24 }
  0x27   : > { %p918_p12 = pnand %p917_p11, %p1071_p5  ;;  %p925_p2 = por %p924_p1, %p923_p0 }
  0x29   : > { %p919_p13 = pneg %p918_p12 }
  0x2b   : > { %p926_p3 = pnand %p925_p2, %p919_p13 }
  0xf1   : > { %v455_v9 = vpop.f32.mrb[0].mxu0 }
  0xf2   : > { %v538_v10 = vpop.f32.mrb[0].mxu1  ;;  %460 = vst.msk [vmem:[#allocation2] sm:$0xff] %vm459_vm5, %v455_v9  ;;  %v859_v11 = vpop.f32.mrb[1].mxu0 }
  0xf3   : > { %v864_v12 = vpop.f32.mrb[1].mxu1 }
  0xf5   : > { %v619_v13 = vpop.f32.mrb[2].mxu0 }
  0xf6   : > { %v700_v14 = vpop.f32.mrb[2].mxu1  ;;  %v869_v15 = vpop.f32.mrb[3].mxu0 }
  0xf7   : > { %v874_v16 = vpop.f32.mrb[3].mxu1 }
  0xf9   : > { %v461_v17 = vld [vmem:[#allocation2] sm:$0xff] }
  0xfa   : > { %v542_v18 = vadd.f32 %v538_v10, %v461_v17 }
  0xfc   : > { %543 = vst.msk [vmem:[#allocation2] sm:$0xff] %vm459_vm5, %v542_v18 }
 0x103   : > { %v544_v19 = vld [vmem:[#allocation2] sm:$0xff] }
 0x104   : > { %v623_v20 = vadd.f32 %v619_v13, %v544_v19 }
 0x106   : > { %624 = vst.msk [vmem:[#allocation2] sm:$0xff] %vm459_vm5, %v623_v20 }
 0x10d   : > { %v625_v21 = vld [vmem:[#allocation2] sm:$0xff] }
 0x10e   : > { %v704_v22 = vadd.f32 %v700_v14, %v625_v21 }
 0x110   : > { %705 = vst.msk [vmem:[#allocation2] sm:$0xff] %vm459_vm5, %v704_v22 }
 0x117   : > { %v706_v24 = vld [vmem:[#allocation2] sm:$0xff] }
 0x118   : > { %v714_v25 = vadd.f32 %v842_v23, %v706_v24 }
 0x11a   : > { %715 = vst.msk [vmem:[%s362_s14] sm:$0xff] %vm459_vm5, %v714_v25 }
 0x11b   : > { %929 = shalt.err (!%p926_p3)
}
 0x11c   : > { %s930_s28 = scalar_lea.hbm %s1129_s22, 128  ;;  %s934_s5 = scalar_lea.hbm %s1181_s9, 256 }
 0x11d   : > { %p931_p4 = scmp.ne.s32.totalorder %s1129_s22, %s930_s28  ;;  %p935_p9 = scmp.lt.u32.totalorder %s1129_s22, %s1181_s9 }
 0x11e   : > { %p936_p10 = scmp.lt.u32.totalorder %s934_s5, %s930_s28  ;;  %p938_p12 = scmp.lt.u32.totalorder %s930_s28, %s1129_s22 }
 0x11f   : > { %p932_p7 = pnand %p931_p4, %p1071_p5 }
 0x120   : > { %p937_p11 = por %p936_p10, %p935_p9 }
 0x121   : > { %p933_p8 = pneg %p932_p7 }
 0x122   : > { %p939_p13 = por %p938_p12, %p937_p11 }
 0x124   : > { %p940_p0 = pnand %p939_p13, %p933_p8 }
 0x126   : > { %943 = shalt.err (!%p940_p0)
}
 0x127   : > { %875 = dma.vmem_to_hbm [thread:$0]  (%p1071_p5), %s1131_s16, 128, %s1129_s22, %s717_s23  }
 0x128 PF: > { %p881_p1 = scmp.ge.s32.totalorder %s978_s12, 2  ;;  %s742_s14 = sand.u32 1, %s966_s30  }
 0x129   : > { %s743_s17 = scalar_lea.sflag [#allocation4], %s742_s14 }
 0x12a   : > { %p878_p2 = pnand %p881_p1, %p1075_p6 }
 0x12c   : > { %961 = dma.done.wait (!%p878_p2), %s743_s17, 128  }
 0x12d   : > { %963 = vsyncadd (!%p878_p2), %s743_s17, 4294967168  ;;  %p19_p3 = scmp.ge.s32.totalorder %s1058_s15, 4   ;;  %s1190_s30 = smov %s970_s10 }
 0x12e   : > { %s1191_s10 = smov %s974_s11  ;;  %s1192_s11 = smov %s1069_s18 }
 0x12f   : > { %s1193_s12 = smov %s1058_s15  ;;  %21 = sbr.rel (!%p19_p3) target bundleno = 7 (0x7), region = 100 }
 0x136   :  { %748 = vsyncpa [#allocation4], 1 }
 0x137   :  { %750 = vsyncpa [#allocation4 + $0x1], 1 }

</bundles_post_ra>
